<compile_context>
chip_gen: v6e
topology: v6e:2x2x1
jax: 0.10.0
libtpu: 0.0.40
codegen_flags: <defaults>
</compile_context>

<pallas_src>
import functools

import jax
import jax.numpy as jnp
from jax.experimental import pallas as pl
from jax.experimental.pallas import tpu as pltpu


def _knn_kernel(p_ref, w_ref, b_ref, o_ref, *, k: int, n_patches: int):
    # p_ref: (K, T) patch tile, w_ref: (N, K) dictionary, b_ref: (N, 1) bias.
    d = jnp.dot(w_ref[...], p_ref[...], preferred_element_type=jnp.float32)
    d = d + b_ref[...]                                   # (N, T) distances

    # k-th smallest along the dictionary (sublane) axis via pairwise counting
    # (exact torch.kthvalue semantics, ties included): entry j holds the k-th
    # smallest iff #{l : d[l,:] <= d[j,:]} >= k; the k-th value is the minimum
    # such candidate.  Running minimum keeps only one live candidate vreg; all
    # work is VPU compares + sublane reductions (large T on the lane axis).
    inf = jnp.float32(jnp.inf)
    kth = jnp.full((1, d.shape[1]), inf, dtype=jnp.float32)
    for j in range(n_patches):
        dj = d[j:j + 1, :]                               # (1, T) sublane row read
        cnt = jnp.sum((d <= dj).astype(jnp.float32), axis=0, keepdims=True)
        kth = jnp.minimum(kth, jnp.where(cnt >= k, dj, inf))

    o_ref[...] = (d <= kth).astype(jnp.float32)          # (N, T) mask (>k ones on ties)


def _round_up(x, m):
    return (x + m - 1) // m * m


def knearest_patches_embedding(images, kernel, bias, stride, padding, k, *, tile_s=1024):
    """return_as_mask=True branch of the PyTorch module.

    images: (B, C, H, W) float32; kernel: (N, C, kh, kw); bias: (N,)
    returns: (B, N, H_out, W_out) float32 mask.
    """
    # TODO(synk): return_as_mask=False (topk indices) branch is not implemented.
    B, C, H, W = images.shape
    N, Ck, kh, kw = kernel.shape
    assert Ck == C
    assert 1 <= k <= N, "k must satisfy 1 <= k <= dictionary size (torch.kthvalue would raise)"
    s, p = stride, padding
    Ho = (H + 2 * p - kh) // s + 1
    Wo = (W + 2 * p - kw) // s + 1
    S = Ho * Wo
    K = C * kh * kw

    # --- glue: im2col straight into the (B, K, S) order the kernel consumes --------
    # Feature order is (C-major, kh, kw), matching torch's OIHW weight flatten.
    # TODO(synk): for production image sizes, fuse im2col into the kernel
    # (memory_space=pl.ANY + manual pltpu.make_async_copy per (dy, dx) offset) so each
    # pixel is read once from HBM instead of kh*kw times.
    xp = jnp.pad(images, ((0, 0), (0, 0), (p, p), (p, p)))
    cols = [xp[:, :, dy:dy + s * Ho:s, dx:dx + s * Wo:s]        # (B, C, Ho, Wo)
            for dy in range(kh) for dx in range(kw)]
    patches = jnp.stack(cols, axis=2).reshape(B, K, S).astype(jnp.float32)

    # Spatial tiling: lane-dense tiles (multiple of 128); pad the tail and slice it
    # off afterwards (no divisibility requirement on B*Ho*Wo).
    tile = min(tile_s, _round_up(S, 128))
    tile = _round_up(tile, 128)
    S_pad = _round_up(S, tile)
    if S_pad != S:
        patches = jnp.pad(patches, ((0, 0), (0, 0), (0, S_pad - S)))

    w_mat = kernel.reshape(N, K).astype(jnp.float32)            # (N, K)
    b_mat = bias.reshape(N, 1).astype(jnp.float32)              # (N, 1)

    grid = (B, S_pad // tile)                                   # >= 2 steps for B >= 2
    out = pl.pallas_call(
        functools.partial(_knn_kernel, k=k, n_patches=N),
        out_shape=jax.ShapeDtypeStruct((B, N, S_pad), jnp.float32),
        grid_spec=pltpu.PrefetchScalarGridSpec(
            num_scalar_prefetch=0,
            grid=grid,
            in_specs=[
                pl.BlockSpec((None, K, tile), lambda b, i: (b, 0, i)),  # patch tile
                pl.BlockSpec((N, K), lambda b, i: (0, 0)),              # dictionary (resident)
                pl.BlockSpec((N, 1), lambda b, i: (0, 0)),              # bias (resident)
            ],
            out_specs=pl.BlockSpec((None, N, tile), lambda b, i: (b, 0, i)),
        ),
        compiler_params=pltpu.CompilerParams(
            dimension_semantics=("parallel", "parallel"),
        ),
    )(patches, w_mat, b_mat)

    # Already in (B, N, S) layout from the kernel; drop padded tail, restore spatial.
    return out[:, :, :S].reshape(B, N, Ho, Wo)


if __name__ == "__main__":
    key = jax.random.PRNGKey(0)
    k_img, k_w, k_b = jax.random.split(key, 3)

    # Small, module-consistent shapes.
    B, C, H, W = 2, 4, 16, 16
    N, kh, kw = 16, 3, 3          # dictionary of N patches of shape (C, kh, kw)
    stride, padding, k = 1, 1, 3

    images = jax.random.normal(k_img, (B, C, H, W), dtype=jnp.float32)
    kernel = jax.random.normal(k_w, (N, C, kh, kw), dtype=jnp.float32)
    bias = jax.random.normal(k_b, (N,), dtype=jnp.float32)

    mask = knearest_patches_embedding(images, kernel, bias, stride, padding, k)
    mask = jax.block_until_ready(mask)
    assert mask.shape == (B, N, H, W)
    assert mask.dtype == jnp.float32

    # Pure-JAX reference (F.conv2d + kthvalue + le).
    dist = jax.lax.conv_general_dilated(
        images, kernel, (stride, stride), [(padding, padding), (padding, padding)],
        dimension_numbers=("NCHW", "OIHW", "NCHW"))
    dist = dist + bias[None, :, None, None]
    kth = jnp.sort(dist, axis=1)[:, k - 1:k]
    ref = (dist <= kth).astype(jnp.float32)

    assert int(jnp.sum(jnp.abs(mask - ref))) == 0, "mask mismatch vs reference"
    print("KERNEL_OK")
</pallas_src>

<mosaic_0001>
module attributes {stable_mosaic.version = 11 : i64} {
  func.func @_knn_kernel(%arg0: i32, %arg1: i32, %arg2: memref<1x36x256xf32, #tpu.memory_space<vmem>>, %arg3: memref<16x36xf32, #tpu.memory_space<vmem>>, %arg4: memref<16x1xf32, #tpu.memory_space<vmem>>, %arg5: memref<1x16x256xf32, #tpu.memory_space<vmem>>) attributes {dimension_semantics = [#tpu.dimension_semantics<parallel>, #tpu.dimension_semantics<parallel>], iteration_bounds = array<i64: 2, 1>, scalar_prefetch = 0 : i64, scratch_operands = 0 : i64, tpu.core_type = #tpu.core_type<tc>, window_params = [{transform_indices = @transform_0, window_bounds = array<i64: 1, 36, 256>}, {pipeline_mode = #tpu.pipeline_mode<synchronous>, transform_indices = @transform_1, window_bounds = array<i64: 16, 36>}, {pipeline_mode = #tpu.pipeline_mode<synchronous>, transform_indices = @transform_2, window_bounds = array<i64: 16, 1>}, {transform_indices = @transform_3, window_bounds = array<i64: 1, 16, 256>}]} {
    %c0 = arith.constant 0 : index
    %c0_0 = arith.constant 0 : index
    %0 = vector.load %arg3[%c0, %c0_0] : memref<16x36xf32, #tpu.memory_space<vmem>>, vector<16x36xf32>
    %c0_1 = arith.constant 0 : index
    %c0_2 = arith.constant 0 : index
    %c0_3 = arith.constant 0 : index
    %1 = vector.load %arg2[%c0_1, %c0_2, %c0_3] : memref<1x36x256xf32, #tpu.memory_space<vmem>>, vector<1x36x256xf32>
    %2 = vector.shape_cast %1 : vector<1x36x256xf32> to vector<36x256xf32>
    %cst = arith.constant dense<0.000000e+00> : vector<16x256xf32>
    %3 = tpu.matmul %0, %2, %cst {dimension_numbers = #tpu.dot_dimension_numbers<[1], [0], [0], [1], [0, 0, 1, 1], [], []>} : vector<16x36xf32>, vector<36x256xf32>, vector<16x256xf32> -> vector<16x256xf32>
    %c0_4 = arith.constant 0 : index
    %c0_5 = arith.constant 0 : index
    %4 = vector.load %arg4[%c0_4, %c0_5] : memref<16x1xf32, #tpu.memory_space<vmem>>, vector<16x1xf32>
    %5 = vector.broadcast %4 : vector<16x1xf32> to vector<16x256xf32>
    %6 = arith.addf %3, %5 : vector<16x256xf32>
    %cst_6 = arith.constant 0x7F800000 : f32
    %7 = vector.broadcast %cst_6 : f32 to vector<1x256xf32>
    %8 = vector.extract_strided_slice %6 {offsets = [0, 0], sizes = [1, 256], strides = [1, 1]} : vector<16x256xf32> to vector<1x256xf32>
    %9 = vector.broadcast %8 : vector<1x256xf32> to vector<16x256xf32>
    %10 = arith.cmpf ole, %6, %9 : vector<16x256xf32>
    %11 = arith.extui %10 : vector<16x256xi1> to vector<16x256xi32>
    %12 = arith.sitofp %11 : vector<16x256xi32> to vector<16x256xf32>
    %cst_7 = arith.constant dense<0.000000e+00> : vector<256xf32>
    %13 = vector.multi_reduction <add>, %12, %cst_7 [0] : vector<16x256xf32> to vector<256xf32>
    %14 = vector.shape_cast %13 : vector<256xf32> to vector<1x256xf32>
    %cst_8 = arith.constant 3.000000e+00 : f32
    %15 = vector.broadcast %cst_8 : f32 to vector<1x256xf32>
    %16 = arith.cmpf oge, %14, %15 : vector<1x256xf32>
    %cst_9 = arith.constant 0x7F800000 : f32
    %17 = vector.broadcast %cst_9 : f32 to vector<1x256xf32>
    %18 = arith.select %16, %8, %17 : vector<1x256xi1>, vector<1x256xf32>
    %19 = arith.minimumf %7, %18 : vector<1x256xf32>
    %20 = vector.extract_strided_slice %6 {offsets = [1, 0], sizes = [1, 256], strides = [1, 1]} : vector<16x256xf32> to vector<1x256xf32>
    %21 = vector.broadcast %20 : vector<1x256xf32> to vector<16x256xf32>
    %22 = arith.cmpf ole, %6, %21 : vector<16x256xf32>
    %23 = arith.extui %22 : vector<16x256xi1> to vector<16x256xi32>
    %24 = arith.sitofp %23 : vector<16x256xi32> to vector<16x256xf32>
    %cst_10 = arith.constant dense<0.000000e+00> : vector<256xf32>
    %25 = vector.multi_reduction <add>, %24, %cst_10 [0] : vector<16x256xf32> to vector<256xf32>
    %26 = vector.shape_cast %25 : vector<256xf32> to vector<1x256xf32>
    %cst_11 = arith.constant 3.000000e+00 : f32
    %27 = vector.broadcast %cst_11 : f32 to vector<1x256xf32>
    %28 = arith.cmpf oge, %26, %27 : vector<1x256xf32>
    %cst_12 = arith.constant 0x7F800000 : f32
    %29 = vector.broadcast %cst_12 : f32 to vector<1x256xf32>
    %30 = arith.select %28, %20, %29 : vector<1x256xi1>, vector<1x256xf32>
    %31 = arith.minimumf %19, %30 : vector<1x256xf32>
    %32 = vector.extract_strided_slice %6 {offsets = [2, 0], sizes = [1, 256], strides = [1, 1]} : vector<16x256xf32> to vector<1x256xf32>
    %33 = vector.broadcast %32 : vector<1x256xf32> to vector<16x256xf32>
    %34 = arith.cmpf ole, %6, %33 : vector<16x256xf32>
    %35 = arith.extui %34 : vector<16x256xi1> to vector<16x256xi32>
    %36 = arith.sitofp %35 : vector<16x256xi32> to vector<16x256xf32>
    %cst_13 = arith.constant dense<0.000000e+00> : vector<256xf32>
    %37 = vector.multi_reduction <add>, %36, %cst_13 [0] : vector<16x256xf32> to vector<256xf32>
    %38 = vector.shape_cast %37 : vector<256xf32> to vector<1x256xf32>
    %cst_14 = arith.constant 3.000000e+00 : f32
    %39 = vector.broadcast %cst_14 : f32 to vector<1x256xf32>
    %40 = arith.cmpf oge, %38, %39 : vector<1x256xf32>
    %cst_15 = arith.constant 0x7F800000 : f32
    %41 = vector.broadcast %cst_15 : f32 to vector<1x256xf32>
    %42 = arith.select %40, %32, %41 : vector<1x256xi1>, vector<1x256xf32>
    %43 = arith.minimumf %31, %42 : vector<1x256xf32>
    %44 = vector.extract_strided_slice %6 {offsets = [3, 0], sizes = [1, 256], strides = [1, 1]} : vector<16x256xf32> to vector<1x256xf32>
    %45 = vector.broadcast %44 : vector<1x256xf32> to vector<16x256xf32>
    %46 = arith.cmpf ole, %6, %45 : vector<16x256xf32>
    %47 = arith.extui %46 : vector<16x256xi1> to vector<16x256xi32>
    %48 = arith.sitofp %47 : vector<16x256xi32> to vector<16x256xf32>
    %cst_16 = arith.constant dense<0.000000e+00> : vector<256xf32>
    %49 = vector.multi_reduction <add>, %48, %cst_16 [0] : vector<16x256xf32> to vector<256xf32>
    %50 = vector.shape_cast %49 : vector<256xf32> to vector<1x256xf32>
    %cst_17 = arith.constant 3.000000e+00 : f32
    %51 = vector.broadcast %cst_17 : f32 to vector<1x256xf32>
    %52 = arith.cmpf oge, %50, %51 : vector<1x256xf32>
    %cst_18 = arith.constant 0x7F800000 : f32
    %53 = vector.broadcast %cst_18 : f32 to vector<1x256xf32>
    %54 = arith.select %52, %44, %53 : vector<1x256xi1>, vector<1x256xf32>
    %55 = arith.minimumf %43, %54 : vector<1x256xf32>
    %56 = vector.extract_strided_slice %6 {offsets = [4, 0], sizes = [1, 256], strides = [1, 1]} : vector<16x256xf32> to vector<1x256xf32>
    %57 = vector.broadcast %56 : vector<1x256xf32> to vector<16x256xf32>
    %58 = arith.cmpf ole, %6, %57 : vector<16x256xf32>
    %59 = arith.extui %58 : vector<16x256xi1> to vector<16x256xi32>
    %60 = arith.sitofp %59 : vector<16x256xi32> to vector<16x256xf32>
    %cst_19 = arith.constant dense<0.000000e+00> : vector<256xf32>
    %61 = vector.multi_reduction <add>, %60, %cst_19 [0] : vector<16x256xf32> to vector<256xf32>
    %62 = vector.shape_cast %61 : vector<256xf32> to vector<1x256xf32>
    %cst_20 = arith.constant 3.000000e+00 : f32
    %63 = vector.broadcast %cst_20 : f32 to vector<1x256xf32>
    %64 = arith.cmpf oge, %62, %63 : vector<1x256xf32>
    %cst_21 = arith.constant 0x7F800000 : f32
    %65 = vector.broadcast %cst_21 : f32 to vector<1x256xf32>
    %66 = arith.select %64, %56, %65 : vector<1x256xi1>, vector<1x256xf32>
    %67 = arith.minimumf %55, %66 : vector<1x256xf32>
    %68 = vector.extract_strided_slice %6 {offsets = [5, 0], sizes = [1, 256], strides = [1, 1]} : vector<16x256xf32> to vector<1x256xf32>
    %69 = vector.broadcast %68 : vector<1x256xf32> to vector<16x256xf32>
    %70 = arith.cmpf ole, %6, %69 : vector<16x256xf32>
    %71 = arith.extui %70 : vector<16x256xi1> to vector<16x256xi32>
    %72 = arith.sitofp %71 : vector<16x256xi32> to vector<16x256xf32>
    %cst_22 = arith.constant dense<0.000000e+00> : vector<256xf32>
    %73 = vector.multi_reduction <add>, %72, %cst_22 [0] : vector<16x256xf32> to vector<256xf32>
    %74 = vector.shape_cast %73 : vector<256xf32> to vector<1x256xf32>
    %cst_23 = arith.constant 3.000000e+00 : f32
    %75 = vector.broadcast %cst_23 : f32 to vector<1x256xf32>
    %76 = arith.cmpf oge, %74, %75 : vector<1x256xf32>
    %cst_24 = arith.constant 0x7F800000 : f32
    %77 = vector.broadcast %cst_24 : f32 to vector<1x256xf32>
    %78 = arith.select %76, %68, %77 : vector<1x256xi1>, vector<1x256xf32>
    %79 = arith.minimumf %67, %78 : vector<1x256xf32>
    %80 = vector.extract_strided_slice %6 {offsets = [6, 0], sizes = [1, 256], strides = [1, 1]} : vector<16x256xf32> to vector<1x256xf32>
    %81 = vector.broadcast %80 : vector<1x256xf32> to vector<16x256xf32>
    %82 = arith.cmpf ole, %6, %81 : vector<16x256xf32>
    %83 = arith.extui %82 : vector<16x256xi1> to vector<16x256xi32>
    %84 = arith.sitofp %83 : vector<16x256xi32> to vector<16x256xf32>
    %cst_25 = arith.constant dense<0.000000e+00> : vector<256xf32>
    %85 = vector.multi_reduction <add>, %84, %cst_25 [0] : vector<16x256xf32> to vector<256xf32>
    %86 = vector.shape_cast %85 : vector<256xf32> to vector<1x256xf32>
    %cst_26 = arith.constant 3.000000e+00 : f32
    %87 = vector.broadcast %cst_26 : f32 to vector<1x256xf32>
    %88 = arith.cmpf oge, %86, %87 : vector<1x256xf32>
    %cst_27 = arith.constant 0x7F800000 : f32
    %89 = vector.broadcast %cst_27 : f32 to vector<1x256xf32>
    %90 = arith.select %88, %80, %89 : vector<1x256xi1>, vector<1x256xf32>
    %91 = arith.minimumf %79, %90 : vector<1x256xf32>
    %92 = vector.extract_strided_slice %6 {offsets = [7, 0], sizes = [1, 256], strides = [1, 1]} : vector<16x256xf32> to vector<1x256xf32>
    %93 = vector.broadcast %92 : vector<1x256xf32> to vector<16x256xf32>
    %94 = arith.cmpf ole, %6, %93 : vector<16x256xf32>
    %95 = arith.extui %94 : vector<16x256xi1> to vector<16x256xi32>
    %96 = arith.sitofp %95 : vector<16x256xi32> to vector<16x256xf32>
    %cst_28 = arith.constant dense<0.000000e+00> : vector<256xf32>
    %97 = vector.multi_reduction <add>, %96, %cst_28 [0] : vector<16x256xf32> to vector<256xf32>
    %98 = vector.shape_cast %97 : vector<256xf32> to vector<1x256xf32>
    %cst_29 = arith.constant 3.000000e+00 : f32
    %99 = vector.broadcast %cst_29 : f32 to vector<1x256xf32>
    %100 = arith.cmpf oge, %98, %99 : vector<1x256xf32>
    %cst_30 = arith.constant 0x7F800000 : f32
    %101 = vector.broadcast %cst_30 : f32 to vector<1x256xf32>
    %102 = arith.select %100, %92, %101 : vector<1x256xi1>, vector<1x256xf32>
    %103 = arith.minimumf %91, %102 : vector<1x256xf32>
    %104 = vector.extract_strided_slice %6 {offsets = [8, 0], sizes = [1, 256], strides = [1, 1]} : vector<16x256xf32> to vector<1x256xf32>
    %105 = vector.broadcast %104 : vector<1x256xf32> to vector<16x256xf32>
    %106 = arith.cmpf ole, %6, %105 : vector<16x256xf32>
    %107 = arith.extui %106 : vector<16x256xi1> to vector<16x256xi32>
    %108 = arith.sitofp %107 : vector<16x256xi32> to vector<16x256xf32>
    %cst_31 = arith.constant dense<0.000000e+00> : vector<256xf32>
    %109 = vector.multi_reduction <add>, %108, %cst_31 [0] : vector<16x256xf32> to vector<256xf32>
    %110 = vector.shape_cast %109 : vector<256xf32> to vector<1x256xf32>
    %cst_32 = arith.constant 3.000000e+00 : f32
    %111 = vector.broadcast %cst_32 : f32 to vector<1x256xf32>
    %112 = arith.cmpf oge, %110, %111 : vector<1x256xf32>
    %cst_33 = arith.constant 0x7F800000 : f32
    %113 = vector.broadcast %cst_33 : f32 to vector<1x256xf32>
    %114 = arith.select %112, %104, %113 : vector<1x256xi1>, vector<1x256xf32>
    %115 = arith.minimumf %103, %114 : vector<1x256xf32>
    %116 = vector.extract_strided_slice %6 {offsets = [9, 0], sizes = [1, 256], strides = [1, 1]} : vector<16x256xf32> to vector<1x256xf32>
    %117 = vector.broadcast %116 : vector<1x256xf32> to vector<16x256xf32>
    %118 = arith.cmpf ole, %6, %117 : vector<16x256xf32>
    %119 = arith.extui %118 : vector<16x256xi1> to vector<16x256xi32>
    %120 = arith.sitofp %119 : vector<16x256xi32> to vector<16x256xf32>
    %cst_34 = arith.constant dense<0.000000e+00> : vector<256xf32>
    %121 = vector.multi_reduction <add>, %120, %cst_34 [0] : vector<16x256xf32> to vector<256xf32>
    %122 = vector.shape_cast %121 : vector<256xf32> to vector<1x256xf32>
    %cst_35 = arith.constant 3.000000e+00 : f32
    %123 = vector.broadcast %cst_35 : f32 to vector<1x256xf32>
    %124 = arith.cmpf oge, %122, %123 : vector<1x256xf32>
    %cst_36 = arith.constant 0x7F800000 : f32
    %125 = vector.broadcast %cst_36 : f32 to vector<1x256xf32>
    %126 = arith.select %124, %116, %125 : vector<1x256xi1>, vector<1x256xf32>
    %127 = arith.minimumf %115, %126 : vector<1x256xf32>
    %128 = vector.extract_strided_slice %6 {offsets = [10, 0], sizes = [1, 256], strides = [1, 1]} : vector<16x256xf32> to vector<1x256xf32>
    %129 = vector.broadcast %128 : vector<1x256xf32> to vector<16x256xf32>
    %130 = arith.cmpf ole, %6, %129 : vector<16x256xf32>
    %131 = arith.extui %130 : vector<16x256xi1> to vector<16x256xi32>
    %132 = arith.sitofp %131 : vector<16x256xi32> to vector<16x256xf32>
    %cst_37 = arith.constant dense<0.000000e+00> : vector<256xf32>
    %133 = vector.multi_reduction <add>, %132, %cst_37 [0] : vector<16x256xf32> to vector<256xf32>
    %134 = vector.shape_cast %133 : vector<256xf32> to vector<1x256xf32>
    %cst_38 = arith.constant 3.000000e+00 : f32
    %135 = vector.broadcast %cst_38 : f32 to vector<1x256xf32>
    %136 = arith.cmpf oge, %134, %135 : vector<1x256xf32>
    %cst_39 = arith.constant 0x7F800000 : f32
    %137 = vector.broadcast %cst_39 : f32 to vector<1x256xf32>
    %138 = arith.select %136, %128, %137 : vector<1x256xi1>, vector<1x256xf32>
    %139 = arith.minimumf %127, %138 : vector<1x256xf32>
    %140 = vector.extract_strided_slice %6 {offsets = [11, 0], sizes = [1, 256], strides = [1, 1]} : vector<16x256xf32> to vector<1x256xf32>
    %141 = vector.broadcast %140 : vector<1x256xf32> to vector<16x256xf32>
    %142 = arith.cmpf ole, %6, %141 : vector<16x256xf32>
    %143 = arith.extui %142 : vector<16x256xi1> to vector<16x256xi32>
    %144 = arith.sitofp %143 : vector<16x256xi32> to vector<16x256xf32>
    %cst_40 = arith.constant dense<0.000000e+00> : vector<256xf32>
    %145 = vector.multi_reduction <add>, %144, %cst_40 [0] : vector<16x256xf32> to vector<256xf32>
    %146 = vector.shape_cast %145 : vector<256xf32> to vector<1x256xf32>
    %cst_41 = arith.constant 3.000000e+00 : f32
    %147 = vector.broadcast %cst_41 : f32 to vector<1x256xf32>
    %148 = arith.cmpf oge, %146, %147 : vector<1x256xf32>
    %cst_42 = arith.constant 0x7F800000 : f32
    %149 = vector.broadcast %cst_42 : f32 to vector<1x256xf32>
    %150 = arith.select %148, %140, %149 : vector<1x256xi1>, vector<1x256xf32>
    %151 = arith.minimumf %139, %150 : vector<1x256xf32>
    %152 = vector.extract_strided_slice %6 {offsets = [12, 0], sizes = [1, 256], strides = [1, 1]} : vector<16x256xf32> to vector<1x256xf32>
    %153 = vector.broadcast %152 : vector<1x256xf32> to vector<16x256xf32>
    %154 = arith.cmpf ole, %6, %153 : vector<16x256xf32>
    %155 = arith.extui %154 : vector<16x256xi1> to vector<16x256xi32>
    %156 = arith.sitofp %155 : vector<16x256xi32> to vector<16x256xf32>
    %cst_43 = arith.constant dense<0.000000e+00> : vector<256xf32>
    %157 = vector.multi_reduction <add>, %156, %cst_43 [0] : vector<16x256xf32> to vector<256xf32>
    %158 = vector.shape_cast %157 : vector<256xf32> to vector<1x256xf32>
    %cst_44 = arith.constant 3.000000e+00 : f32
    %159 = vector.broadcast %cst_44 : f32 to vector<1x256xf32>
    %160 = arith.cmpf oge, %158, %159 : vector<1x256xf32>
    %cst_45 = arith.constant 0x7F800000 : f32
    %161 = vector.broadcast %cst_45 : f32 to vector<1x256xf32>
    %162 = arith.select %160, %152, %161 : vector<1x256xi1>, vector<1x256xf32>
    %163 = arith.minimumf %151, %162 : vector<1x256xf32>
    %164 = vector.extract_strided_slice %6 {offsets = [13, 0], sizes = [1, 256], strides = [1, 1]} : vector<16x256xf32> to vector<1x256xf32>
    %165 = vector.broadcast %164 : vector<1x256xf32> to vector<16x256xf32>
    %166 = arith.cmpf ole, %6, %165 : vector<16x256xf32>
    %167 = arith.extui %166 : vector<16x256xi1> to vector<16x256xi32>
    %168 = arith.sitofp %167 : vector<16x256xi32> to vector<16x256xf32>
    %cst_46 = arith.constant dense<0.000000e+00> : vector<256xf32>
    %169 = vector.multi_reduction <add>, %168, %cst_46 [0] : vector<16x256xf32> to vector<256xf32>
    %170 = vector.shape_cast %169 : vector<256xf32> to vector<1x256xf32>
    %cst_47 = arith.constant 3.000000e+00 : f32
    %171 = vector.broadcast %cst_47 : f32 to vector<1x256xf32>
    %172 = arith.cmpf oge, %170, %171 : vector<1x256xf32>
    %cst_48 = arith.constant 0x7F800000 : f32
    %173 = vector.broadcast %cst_48 : f32 to vector<1x256xf32>
    %174 = arith.select %172, %164, %173 : vector<1x256xi1>, vector<1x256xf32>
    %175 = arith.minimumf %163, %174 : vector<1x256xf32>
    %176 = vector.extract_strided_slice %6 {offsets = [14, 0], sizes = [1, 256], strides = [1, 1]} : vector<16x256xf32> to vector<1x256xf32>
    %177 = vector.broadcast %176 : vector<1x256xf32> to vector<16x256xf32>
    %178 = arith.cmpf ole, %6, %177 : vector<16x256xf32>
    %179 = arith.extui %178 : vector<16x256xi1> to vector<16x256xi32>
    %180 = arith.sitofp %179 : vector<16x256xi32> to vector<16x256xf32>
    %cst_49 = arith.constant dense<0.000000e+00> : vector<256xf32>
    %181 = vector.multi_reduction <add>, %180, %cst_49 [0] : vector<16x256xf32> to vector<256xf32>
    %182 = vector.shape_cast %181 : vector<256xf32> to vector<1x256xf32>
    %cst_50 = arith.constant 3.000000e+00 : f32
    %183 = vector.broadcast %cst_50 : f32 to vector<1x256xf32>
    %184 = arith.cmpf oge, %182, %183 : vector<1x256xf32>
    %cst_51 = arith.constant 0x7F800000 : f32
    %185 = vector.broadcast %cst_51 : f32 to vector<1x256xf32>
    %186 = arith.select %184, %176, %185 : vector<1x256xi1>, vector<1x256xf32>
    %187 = arith.minimumf %175, %186 : vector<1x256xf32>
    %188 = vector.extract_strided_slice %6 {offsets = [15, 0], sizes = [1, 256], strides = [1, 1]} : vector<16x256xf32> to vector<1x256xf32>
    %189 = vector.broadcast %188 : vector<1x256xf32> to vector<16x256xf32>
    %190 = arith.cmpf ole, %6, %189 : vector<16x256xf32>
    %191 = arith.extui %190 : vector<16x256xi1> to vector<16x256xi32>
    %192 = arith.sitofp %191 : vector<16x256xi32> to vector<16x256xf32>
    %cst_52 = arith.constant dense<0.000000e+00> : vector<256xf32>
    %193 = vector.multi_reduction <add>, %192, %cst_52 [0] : vector<16x256xf32> to vector<256xf32>
    %194 = vector.shape_cast %193 : vector<256xf32> to vector<1x256xf32>
    %cst_53 = arith.constant 3.000000e+00 : f32
    %195 = vector.broadcast %cst_53 : f32 to vector<1x256xf32>
    %196 = arith.cmpf oge, %194, %195 : vector<1x256xf32>
    %cst_54 = arith.constant 0x7F800000 : f32
    %197 = vector.broadcast %cst_54 : f32 to vector<1x256xf32>
    %198 = arith.select %196, %188, %197 : vector<1x256xi1>, vector<1x256xf32>
    %199 = arith.minimumf %187, %198 : vector<1x256xf32>
    %200 = vector.broadcast %199 : vector<1x256xf32> to vector<16x256xf32>
    %201 = arith.cmpf ole, %6, %200 : vector<16x256xf32>
    %202 = arith.extui %201 : vector<16x256xi1> to vector<16x256xi32>
    %203 = arith.sitofp %202 : vector<16x256xi32> to vector<16x256xf32>
    %c0_55 = arith.constant 0 : index
    %c0_56 = arith.constant 0 : index
    %c0_57 = arith.constant 0 : index
    %204 = vector.load %arg5[%c0_55, %c0_56, %c0_57] : memref<1x16x256xf32, #tpu.memory_space<vmem>>, vector<1x16x256xf32>
    %205 = vector.shape_cast %204 : vector<1x16x256xf32> to vector<16x256xf32>
    %206 = vector.shape_cast %203 : vector<16x256xf32> to vector<1x16x256xf32>
    tpu.vector_store %arg5[%c0_55, %c0_56, %c0_57], %206 {strides = array<i32>} : memref<1x16x256xf32, #tpu.memory_space<vmem>>, vector<1x16x256xf32>,
    return
  }
  func.func @transform_0(%arg0: i32, %arg1: i32) -> (i32, i32, i32) {
    %c0_i32 = arith.constant 0 : i32
    %c0_i32_0 = arith.constant 0 : i32
    return %arg0, %c0_i32, %arg1 : i32, i32, i32
  }
  func.func @transform_1(%arg0: i32, %arg1: i32) -> (i32, i32) {
    %c0_i32 = arith.constant 0 : i32
    %c0_i32_0 = arith.constant 0 : i32
    %c0_i32_1 = arith.constant 0 : i32
    return %c0_i32, %c0_i32_0 : i32, i32
  }
  func.func @transform_2(%arg0: i32, %arg1: i32) -> (i32, i32) {
    %c0_i32 = arith.constant 0 : i32
    %c0_i32_0 = arith.constant 0 : i32
    %c0_i32_1 = arith.constant 0 : i32
    return %c0_i32, %c0_i32_0 : i32, i32
  }
  func.func @transform_3(%arg0: i32, %arg1: i32) -> (i32, i32, i32) {
    %c0_i32 = arith.constant 0 : i32
    %c0_i32_0 = arith.constant 0 : i32
    return %arg0, %c0_i32, %arg1 : i32, i32, i32
  }
}

</mosaic_0001>

<bundles_post_ra>
// kernel: tpu_custom_call.1
= control target key start
LH: loop header
LB: loop body
LE: loop exit
PB: predicated region body
PF: predicated region fallthrough
CT: control target
= control target key end

     0   :  { %8 = vsyncpa [#allocation3], 0  ;;  %s1827_s0 = inlined_call_operand.vmem [shape: f32[2,36,256], index: 0, kind: input, shape index: {}]   ;;  %s1828_s1 = inlined_call_operand.vmem [shape: f32[16,36], index: 1, kind: input, shape index: {}]   ;;  %s1829_s2 = inlined_call_operand.vmem [shape: f32[16,1], index: 2, kind: input, shape index: {}]   ;;  %s1830_s3 = inlined_call_operand.hbm [shape: f32[2,16,256], index: 3, kind: output, shape index: {}]  }
   0x1   :  { %10 = vsyncpa [#allocation3 + $0x1], 0  ;;  %s1415_s12 = smov 0   ;;  %s1417_s13 = smov 0  }
   0x2   :  { %s1419_s14 = smov 0   ;;  %s1421_s15 = smov 0  }
   0x3   :  { %s1423_s16 = smov 0   ;;  %s1425_s17 = smov 0  }
   0x4 LB: > { %s1156_s18 = sadd.s32 4294967295, %s1388_s17   ;;  %s1157_s19 = sadd.s32 4294967294, %s1388_s17   ;;  %s1388_s17 = sphi %s1425_s17, %s16_s17   ;;  %s1384_s16 = sphi %s1423_s16, %s1837_s16   ;;  %s1380_s15 = sphi %s1421_s15, %s1836_s15   ;;  %s1376_s14 = sphi %s1419_s14, %s1835_s14   ;;  %s1372_s13 = sphi %s1417_s13, %s1834_s13   ;;  %s1368_s12 = sphi %s1415_s12, %s1833_s12  }
   0x5   : > { %s28_s20 = sadd.s32 1, %s1384_s16  ;;  %s107_s21 = sadd.s32 1, %s1376_s14 }
   0x6   : > { %p30_p0 = scmp.ge.s32.totalorder %s28_s20, 2  ;;  %p117_p1 = scmp.ne.s32.totalorder %s1376_s14, %s1372_s13 }
   0x7   : > { %p118_p2 = scmp.eq.s32.totalorder %s1156_s18, 1  ;;  %p123_p3 = scmp.ne.s32.totalorder %s1372_s13, %s1368_s12 }
   0x8   : > { %s1839_s20 = smov (%p30_p0, %s28_s20), 0  ;;  %p124_p5 = scmp.eq.s32.totalorder %s1157_s19, 1 }
   0x9   : > { %p1455_p4 = por %p118_p2, %p117_p1  ;;  %s102_s23 = ssub.s32 %s1384_s16, %s1839_s20 }
   0xa   : > { %p1160_p6 = scmp.ge.s32.totalorder %s1388_s17, 1  ;;  %p105_p7 = scmp.eq.s32.totalorder %s102_s23, 0 }
   0xb   : > { %p1462_p8 = por %p124_p5, %p123_p3  ;;  %p161_p9 = scmp.lt.s32.totalorder %s1388_s17, 3 }
   0xc   : > { %s1468_s25 = scalar_select %p105_p7, %s1376_s14, %s107_s21  }
   0xd   : > { %p162_p10 = pnand %p1160_p6, %p161_p9 }
   0xe   : > { %p190_p11 = scmp.lt.s32.totalorder (!%p162_p10), %s1380_s15, 1  ;;  %s186_s18 = sand.u32 (!%p162_p10), 1, %s1372_s13  }
   0xf   : > { %165 = sbr.rel (%p162_p10) target bundleno = 386 (0x182), region = 32  ;;  %s1161_s19 = sshll.u32 (!%p162_p10), %s186_s18, 5 }
  0x10   : > { %s1240_s21 = sshll.u32 (!%p162_p10), %s1380_s15, 9  ;;  %s188_s23 = scalar_lea.vmem (!%p162_p10), [#allocation2], %s1161_s19 }
  0x11   : > { %s1077_s26 = sshll.u32 (!%p162_p10), %s188_s23, 4  ;;  %s1392_s4 = smov (!%p162_p10), [#allocation2]   ;;  %s1770_s26 = int_to_ptr.vmem [resolvable:$true] %s1077_s26 }
  0x12   : > { %s1312_s30 = scalar_lea.vmem (!%p162_p10), %s1770_s26, 512  ;;  %s1316_s5 = sshll.u32 (!%p162_p10), %s1392_s4, 4  ;;  %s1317_s5 = int_to_ptr.vmem [resolvable:$false] %s1316_s5 }
  0x13   : > { %p1313_p12 = scmp.ne.s32.totalorder (!%p162_p10), %s1770_s26, %s1312_s30  ;;  %s1318_s6 = scalar_lea.vmem (!%p162_p10), %s1317_s5, 1024 }
  0x14   : > { %v1390_v0 = vmov 0.0   ;;  %v212_v1 = vld [vmem:[%s1829_s2] sm:$0xff]  ;;  %s191_s28 = scalar_select %p190_p11, %s1380_s15, 1  ;;  %v1391_v2 = vmov 0   ;;  %v213_v3 = vld [vmem:[%s1829_s2 + $0x8] sm:$0xff]  ;;  %vm231_vm0 = vcmask 1043456   ;;  %v315_v16 = vlaneseq }
  0x15   : > { %302 = vmatprep.mubr.f32.mxu0 %v1390_v0  ;;  %308 = vmatprep.mubr.f32.mxu1 %v1390_v0  ;;  %v200_v14 = vld [vmem:[%s1828_s1] sm:$0xff]  ;;  %vm224_vm1 = vcmask 293888   ;;  %v201_v15 = vld [vmem:[%s1828_s1 + $0x8] sm:$0xff]  ;;  %s1782_s15 = scalar_lea.sflag [#allocation3], %s186_s18  ;;  %p1314_p13 = pnand %p1313_p12, %p1455_p4 }
  0x16   : > { %1311 = vset.pattern.permute.xlu0 %v1391_v2  ;;  %s1251_s29 = smul.u32 80, %s191_s28  ;;  %v1489_v18 = vshrl.u32 %v315_v16, 7  ;;  %p1319_p1 = scmp.lt.s32.totalorder %s1770_s26, %s1317_s5 }
  0x17   : > { %216 = vperm.xlu0 %1311, %v212_v1   ;;  %p1315_p0 = pneg %p1314_p13  ;;  %p1320_p2 = scmp.lt.s32.totalorder %s1318_s6, %s1312_s30 }
  0x18   : > { %s197_s7 = scalar_lea.vmem %s1827_s0, %s1251_s29  ;;  %v1492_v20 = vsub.s32 0, %v1489_v18  ;;  %v1495_v21 = vsub.s32 1, %v1489_v18  ;;  %v1498_v24 = vsub.s32 2, %v1489_v18  ;;  %v1515_v34 = vsub.s32 3, %v1489_v18  ;;  %s1768_s29 = scalar_lea.hbm %s1830_s3, %s1240_s21 }
  0x19   : > { %v211_v4 = vld [vmem:[%s197_s7 + $0x48] sm:$0xf]  ;;  %v210_v5 = vld [vmem:[%s197_s7 + $0x40] sm:$0xf]  ;;  %v209_v6 = vld [vmem:[%s197_s7 + $0x38] sm:$0xff]  ;;  %p1321_p3 = por %p1320_p2, %p1319_p1 }
  0x1a   : > { %1163 = vmatprep.subr.msk.mxu0 %vm231_vm0, %v211_v4  ;;  %1241 = vmatprep.subr.msk.mxu1 %vm231_vm0, %v211_v4  ;;  %v208_v7 = vld [vmem:[%s197_s7 + $0x30] sm:$0xff]  ;;  %v207_v8 = vld [vmem:[%s197_s7 + $0x28] sm:$0xff]  ;;  %v206_v9 = vld [vmem:[%s197_s7 + $0x20] sm:$0xff] }
  0x1b   : > { %221 = vperm.xlu0 %1311, %v213_v3   ;;  %1164 = vmatpush1.msk.msra.mxu0 %vm231_vm0, %v210_v5  ;;  %v205_v10 = vld [vmem:[%s197_s7 + $0x18] sm:$0xff]  ;;  %v204_v11 = vld [vmem:[%s197_s7 + $0x10] sm:$0xff]  ;;  %v203_v12 = vld [vmem:[%s197_s7 + $0x8] sm:$0xff]  ;;  %p1322_p5 = pnand %p1321_p3, %p1315_p0 }
  0x1c   : > { %1246 = vmatpush1.msk.msra.mxu1 %vm231_vm0, %v210_v5  ;;  %262 = vmatprep.subr.mxu0 %v209_v6  ;;  %v202_v13 = vld [vmem:[%s197_s7] sm:$0xff] }
  0x1d   : > { %1242 = vmatprep.subr.mxu1 %v209_v6  ;;  %263 = vmatpush1.msra.mxu0 %v208_v7 }
  0x1e   : > { %1247 = vmatpush1.msra.mxu1 %v208_v7  ;;  %264 = vmatprep.subr.mxu0 %v207_v8 }
  0x1f   : > { %1243 = vmatprep.subr.mxu1 %v207_v8  ;;  %265 = vmatpush1.msra.mxu0 %v206_v9 }
  0x20   : > { %1248 = vmatpush1.msra.mxu1 %v206_v9  ;;  %266 = vmatprep.subr.mxu0 %v205_v10 }
  0x21   : > { %1244 = vmatprep.subr.mxu1 %v205_v10  ;;  %267 = vmatpush1.msra.mxu0 %v204_v11 }
  0x22   : > { %1249 = vmatpush1.msra.mxu1 %v204_v11  ;;  %268 = vmatprep.subr.mxu0 %v203_v12 }
  0x23   : > { %1245 = vmatprep.subr.mxu1 %v203_v12  ;;  %269 = vmatpush1.msra.mxu0 %v202_v13 }
  0x24   : > { %1250 = vmatpush1.msra.mxu1 %v202_v13  ;;  %1165 = vmatmul.mubr.msk.f32.vlgmr.msra.gmra.mxu0 %vm224_vm1, %v200_v14 }
  0x25   : > { %1166 = vmatmul.mubr.msk.f32.vlgmr.msra.gmra.mxu1 %vm224_vm1, %v201_v15 }
  0x92   : > { %v217_v17 = vpop.permute.xlu0 %216 }
  0x96   : > { %v222_v19 = vpop.permute.xlu0 %221 }
  0xe4   : > { %v304_v22 = vpop.f32.mrf.mxu0 }
  0xe5   : > { %v310_v23 = vpop.f32.mrf.mxu1  ;;  %v1500_v25 = vadd.f32 %v304_v22, %v217_v17  ;;  %v1557_v22 = vsub.s32 4, %v1489_v18 }
  0xe6   : > { %v306_v26 = vpop.f32.mrf.mxu0  ;;  %v1502_v28 = vadd.f32 %v310_v23, %v222_v19 }
  0xe7   : > { %v312_v27 = vpop.f32.mrf.mxu1  ;;  %v1504_v29 = vadd.f32 %v306_v26, %v217_v17  ;;  %v318_v30 = vrot.slane %v1500_v25, %v1492_v20  ;;  %v356_v31 = vrot.slane %v1500_v25, %v1495_v21  ;;  %v402_v33 = vrot.slane %v1500_v25, %v1498_v24 }
  0xe8   : > { %v1510_v32 = vadd.f32 %v312_v27, %v222_v19  ;;  %v448_v62 = vrot.slane %v1500_v25, %v1515_v34 }
  0xe9   : > { %v322_v35 = vrot.slane %v1504_v29, %v1492_v20  ;;  %vm323_vm2 = vcmp.le.f32.partialorder %v1500_v25, %v318_v30  ;;  %vm325_vm3 = vcmp.le.f32.partialorder %v1502_v28, %v318_v30  ;;  %v360_v36 = vrot.slane %v1504_v29, %v1495_v21 }
  0xea   : > { %v1167_v37 = vsel %vm323_vm2, 1.0, %v1390_v0  ;;  %v1169_v38 = vsel %vm325_vm3, 1.0, %v1390_v0  ;;  %vm361_vm4 = vcmp.le.f32.partialorder %v1500_v25, %v356_v31  ;;  %vm363_vm5 = vcmp.le.f32.partialorder %v1502_v28, %v356_v31 }
  0xeb   : > { %vm324_vm6 = vcmp.le.f32.partialorder %v1504_v29, %v322_v35  ;;  %vm326_vm7 = vcmp.le.f32.partialorder %v1510_v32, %v322_v35  ;;  %v335_v39 = vadd.f32 %v1169_v38, %v1167_v37  ;;  %vm362_vm8 = vcmp.le.f32.partialorder %v1504_v29, %v360_v36 }
  0xec   : > { %v1168_v40 = vsel %vm324_vm6, 1.0, %v1390_v0  ;;  %v1170_v41 = vsel %vm326_vm7, 1.0, %v1390_v0  ;;  %vm364_vm9 = vcmp.le.f32.partialorder %v1510_v32, %v360_v36  ;;  %v1171_v42 = vsel %vm361_vm4, 1.0, %v1390_v0 }
  0xed   : > { %v336_v43 = vrot.slane %v335_v39, 4  ;;  %v342_v44 = vadd.f32 %v1170_v41, %v1168_v40  ;;  %v1172_v45 = vsel %vm362_vm8, 1.0, %v1390_v0  ;;  %v1173_v46 = vsel %vm363_vm5, 1.0, %v1390_v0 }
  0xee   : > { %v1174_v47 = vsel %vm364_vm9, 1.0, %v1390_v0  ;;  %v373_v48 = vadd.f32 %v1173_v46, %v1171_v42  ;;  %v406_v49 = vrot.slane %v1504_v29, %v1498_v24  ;;  %vm407_vm10 = vcmp.le.f32.partialorder %v1500_v25, %v402_v33 }
  0xef   : > { %v337_v50 = vadd.f32 %v336_v43, %v335_v39  ;;  %v343_v51 = vrot.slane %v342_v44, 4  ;;  %v380_v52 = vadd.f32 %v1174_v47, %v1172_v45  ;;  %vm409_vm11 = vcmp.le.f32.partialorder %v1502_v28, %v402_v33 }
  0xf0   : > { %v374_v53 = vrot.slane %v373_v48, 4  ;;  %vm408_vm12 = vcmp.le.f32.partialorder %v1504_v29, %v406_v49  ;;  %vm410_vm13 = vcmp.le.f32.partialorder %v1510_v32, %v406_v49  ;;  %v1175_v54 = vsel %vm407_vm10, 1.0, %v1390_v0 }
  0xf1   : > { %v338_v55 = vrot.slane %v337_v50, 2  ;;  %v344_v56 = vadd.f32 %v343_v51, %v342_v44  ;;  %v381_v57 = vrot.slane %v380_v52, 4  ;;  %v1176_v58 = vsel %vm408_vm12, 1.0, %v1390_v0 }
  0xf2   : > { %v375_v59 = vadd.f32 %v374_v53, %v373_v48  ;;  %v1177_v60 = vsel %vm409_vm11, 1.0, %v1390_v0  ;;  %v1178_v61 = vsel %vm410_vm13, 1.0, %v1390_v0  ;;  %v452_v3 = vrot.slane %v1504_v29, %v1515_v34 }
  0xf3   : > { %v345_v63 = vrot.slane %v344_v56, 2  ;;  %v382_v1 = vadd.f32 %v381_v57, %v380_v52  ;;  %v419_v2 = vadd.f32 %v1177_v60, %v1175_v54  ;;  %v339_v4 = vadd.f32 %v338_v55, %v337_v50 }
  0xf4   : > { %v376_v5 = vrot.slane %v375_v59, 2  ;;  %v426_v6 = vadd.f32 %v1178_v61, %v1176_v58  ;;  %vm453_vm14 = vcmp.le.f32.partialorder %v1500_v25, %v448_v62  ;;  %vm454_vm15 = vcmp.le.f32.partialorder %v1504_v29, %v452_v3 }
  0xf5   : > { %v346_v7 = vadd.f32 %v345_v63, %v344_v56  ;;  %v383_v8 = vrot.slane %v382_v1, 2  ;;  %v420_v9 = vrot.slane %v419_v2, 4  ;;  %vm455_vm0 = vcmp.le.f32.partialorder %v1502_v28, %v448_v62 }
  0xf6   : > { %v377_v10 = vadd.f32 %v376_v5, %v375_v59  ;;  %v427_v11 = vrot.slane %v426_v6, 4  ;;  %v340_v14 = vrot.slane %v339_v4, 1  ;;  %vm456_vm1 = vcmp.le.f32.partialorder %v1510_v32, %v452_v3 }
  0xf7   : > { %v384_v12 = vadd.f32 %v383_v8, %v382_v1  ;;  %v421_v13 = vadd.f32 %v420_v9, %v419_v2  ;;  %v347_v15 = vrot.slane %v346_v7, 1  ;;  %v1179_v19 = vsel %vm453_vm14, 1.0, %v1390_v0 }
  0xf8   : > { %v378_v16 = vrot.slane %v377_v10, 1  ;;  %v428_v17 = vadd.f32 %v427_v11, %v426_v6  ;;  %v1180_v26 = vsel %vm454_vm15, 1.0, %v1390_v0  ;;  %v1181_v27 = vsel %vm455_vm0, 1.0, %v1390_v0 }
  0xf9   : > { %v385_v23 = vrot.slane %v384_v12, 1  ;;  %v422_v30 = vrot.slane %v421_v13, 2  ;;  %v1182_v31 = vsel %vm456_vm1, 1.0, %v1390_v0  ;;  %v341_v33 = vadd.f32 %v340_v14, %v339_v4 }
  0xfa   : > { %v348_v35 = vadd.f32 %v347_v15, %v346_v7  ;;  %v379_v36 = vadd.f32 %v378_v16, %v377_v10  ;;  %v465_v37 = vadd.f32 %v1181_v27, %v1179_v19  ;;  %v429_v38 = vrot.slane %v428_v17, 2 }
  0xfb   : > { %v472_v39 = vadd.f32 %v1182_v31, %v1180_v26  ;;  %v494_v40 = vrot.slane %v1500_v25, %v1557_v22  ;;  %v386_v41 = vadd.f32 %v385_v23, %v384_v12  ;;  %v1565_v43 = vsub.s32 5, %v1489_v18 }
  0xfc   : > { %v466_v42 = vrot.slane %v465_v37, 4  ;;  %v1568_v44 = vsub.s32 6, %v1489_v18  ;;  %v423_v45 = vadd.f32 %v422_v30, %v421_v13  ;;  %v498_v47 = vrot.slane %v1504_v29, %v1557_v22 }
  0xfd   : > { %v473_v46 = vrot.slane %v472_v39, 4  ;;  %v1573_v48 = vsub.s32 7, %v1489_v18  ;;  %vm349_vm2 = vcmp.ge.f32.partialorder %v341_v33, 3.0  ;;  %vm350_vm3 = vcmp.ge.f32.partialorder %v348_v35, 3.0 }
  0xfe   : > { %vm387_vm4 = vcmp.ge.f32.partialorder %v379_v36, 3.0  ;;  %v467_v49 = vadd.f32 %v466_v42, %v465_v37  ;;  %v430_v50 = vadd.f32 %v429_v38, %v428_v17  ;;  %vm499_vm5 = vcmp.le.f32.partialorder %v1500_v25, %v494_v40 }
  0xff   : > { %v474_v51 = vadd.f32 %v473_v46, %v472_v39  ;;  %vm500_vm6 = vcmp.le.f32.partialorder %v1504_v29, %v498_v47  ;;  %vm388_vm7 = vcmp.ge.f32.partialorder %v386_v41, 3.0  ;;  %vm501_vm8 = vcmp.le.f32.partialorder %v1502_v28, %v494_v40 }
 0x100   : > { %v468_v52 = vrot.slane %v467_v49, 2  ;;  %v540_v53 = vrot.slane %v1500_v25, %v1565_v43  ;;  %v351_v18 = vsel %vm349_vm2, %v1500_v25, inf  ;;  %v389_v54 = vsel %vm387_vm4, %v1500_v25, inf }
 0x101   : > { %v424_v55 = vrot.slane %v423_v45, 1  ;;  %vm502_vm9 = vcmp.le.f32.partialorder %v1510_v32, %v498_v47  ;;  %v1584_v56 = vsel %vm350_vm3, %v1504_v29, inf  ;;  %v475_v57 = vrot.slane %v474_v51, 2 }
 0x102   : > { %v1183_v58 = vsel %vm499_vm5, 1.0, %v1390_v0  ;;  %v1184_v59 = vsel %vm500_vm6, 1.0, %v1390_v0  ;;  %v1589_v60 = vsel %vm388_vm7, %v1504_v29, inf  ;;  %v431_v61 = vrot.slane %v430_v50, 1 }
 0x103   : > { %v1185_v62 = vsel %vm501_vm8, 1.0, %v1390_v0  ;;  %v1186_v63 = vsel %vm502_vm9, 1.0, %v1390_v0  ;;  %v393_v1 = vrot.slane %v389_v54, 1  ;;  %v469_v2 = vadd.f32 %v468_v52, %v467_v49 }
 0x104   : > { %v511_v3 = vadd.f32 %v1185_v62, %v1183_v58  ;;  %v518_v4 = vadd.f32 %v1186_v63, %v1184_v59  ;;  %v425_v5 = vadd.f32 %v424_v55, %v423_v45  ;;  %v544_v6 = vrot.slane %v1504_v29, %v1565_v43 }
 0x105   : > { %vm545_vm10 = vcmp.le.f32.partialorder %v1500_v25, %v540_v53  ;;  %vm547_vm11 = vcmp.le.f32.partialorder %v1502_v28, %v540_v53  ;;  %v476_v7 = vadd.f32 %v475_v57, %v474_v51  ;;  %v432_v11 = vadd.f32 %v431_v61, %v430_v50 }
 0x106   : > { %v512_v8 = vrot.slane %v511_v3, 4  ;;  %v519_v9 = vrot.slane %v518_v4, 4  ;;  %v1187_v10 = vsel %vm545_vm10, 1.0, %v1390_v0  ;;  %vm546_vm12 = vcmp.le.f32.partialorder %v1504_v29, %v544_v6 }
 0x107   : > { %vm548_vm13 = vcmp.le.f32.partialorder %v1510_v32, %v544_v6  ;;  %v1189_v12 = vsel %vm547_vm11, 1.0, %v1390_v0  ;;  %v470_v13 = vrot.slane %v469_v2, 1  ;;  %v1188_v16 = vsel %vm546_vm12, 1.0, %v1390_v0 }
 0x108   : > { %v513_v14 = vadd.f32 %v512_v8, %v511_v3  ;;  %v520_v15 = vadd.f32 %v519_v9, %v518_v4  ;;  %v394_v17 = vrot.slane %v1589_v60, 1  ;;  %vm433_vm14 = vcmp.ge.f32.partialorder %v425_v5, 3.0 }
 0x109   : > { %v1190_v19 = vsel %vm548_vm13, 1.0, %v1390_v0  ;;  %v557_v23 = vadd.f32 %v1189_v12, %v1187_v10  ;;  %v397_v26 = vmin.f32 %v351_v18, %v393_v1  ;;  %v477_v27 = vrot.slane %v476_v7, 1 }
 0x10a   : > { %v514_v30 = vrot.slane %v513_v14, 2  ;;  %v521_v31 = vrot.slane %v520_v15, 2  ;;  %vm434_vm15 = vcmp.ge.f32.partialorder %v432_v11, 3.0  ;;  %v564_v35 = vadd.f32 %v1190_v19, %v1188_v16 }
 0x10b   : > { %v558_v33 = vrot.slane %v557_v23, 4  ;;  %v586_v36 = vrot.slane %v1500_v25, %v1568_v44  ;;  %v435_v37 = vsel %vm433_vm14, %v1500_v25, inf  ;;  %v471_v38 = vadd.f32 %v470_v13, %v469_v2 }
 0x10c   : > { %v515_v39 = vadd.f32 %v514_v30, %v513_v14  ;;  %v590_v40 = vrot.slane %v1504_v29, %v1568_v44  ;;  %v522_v41 = vadd.f32 %v521_v31, %v520_v15  ;;  %v565_v45 = vrot.slane %v564_v35, 4 }
 0x10d   : > { %v559_v42 = vadd.f32 %v558_v33, %v557_v23  ;;  %vm591_vm0 = vcmp.le.f32.partialorder %v1500_v25, %v586_v36  ;;  %v436_v46 = vsel %vm434_vm15, %v1504_v29, inf  ;;  %v478_v47 = vadd.f32 %v477_v27, %v476_v7 }
 0x10e   : > { %vm592_vm1 = vcmp.le.f32.partialorder %v1504_v29, %v590_v40  ;;  %vm593_vm2 = vcmp.le.f32.partialorder %v1502_v28, %v586_v36  ;;  %v516_v49 = vrot.slane %v515_v39, 1  ;;  %v566_v50 = vadd.f32 %v565_v45, %v564_v35 }
 0x10f   : > { %vm594_vm3 = vcmp.le.f32.partialorder %v1510_v32, %v590_v40  ;;  %v1191_v51 = vsel %vm591_vm0, 1.0, %v1390_v0  ;;  %v439_v52 = vrot.slane %v435_v37, 2  ;;  %vm479_vm4 = vcmp.ge.f32.partialorder %v471_v38, 3.0 }
 0x110   : > { %v1192_v53 = vsel %vm592_vm1, 1.0, %v1390_v0  ;;  %v1193_v18 = vsel %vm593_vm2, 1.0, %v1390_v0  ;;  %v523_v54 = vrot.slane %v522_v41, 1  ;;  %v560_v55 = vrot.slane %v559_v42, 2 }
 0x111   : > { %v1194_v57 = vsel %vm594_vm3, 1.0, %v1390_v0  ;;  %v603_v58 = vadd.f32 %v1193_v18, %v1191_v51  ;;  %vm480_vm5 = vcmp.ge.f32.partialorder %v478_v47, 3.0  ;;  %v567_v59 = vrot.slane %v566_v50, 2 }
 0x112   : > { %v610_v60 = vadd.f32 %v1194_v57, %v1192_v53  ;;  %v632_v61 = vrot.slane %v1500_v25, %v1573_v48  ;;  %v398_v62 = vmin.f32 %v1584_v56, %v394_v17  ;;  %v440_v63 = vrot.slane %v436_v46, 2 }
 0x113   : > { %v517_v1 = vadd.f32 %v516_v49, %v515_v39  ;;  %v443_v2 = vmin.f32 %v397_v26, %v439_v52  ;;  %v481_v3 = vsel %vm479_vm4, %v1500_v25, inf  ;;  %v604_v4 = vrot.slane %v603_v58, 4 }
 0x114   : > { %v611_v5 = vrot.slane %v610_v60, 4  ;;  %v482_v6 = vsel %vm480_vm5, %v1504_v29, inf  ;;  %v524_v7 = vadd.f32 %v523_v54, %v522_v41  ;;  %v561_v8 = vadd.f32 %v560_v55, %v559_v42 }
 0x115   : > { %v636_v9 = vrot.slane %v1504_v29, %v1573_v48  ;;  %v568_v10 = vadd.f32 %v567_v59, %v566_v50  ;;  %v605_v11 = vadd.f32 %v604_v4, %v603_v58  ;;  %vm637_vm6 = vcmp.le.f32.partialorder %v1500_v25, %v632_v61 }
 0x116   : > { %v612_v12 = vadd.f32 %v611_v5, %v610_v60  ;;  %v444_v56 = vmin.f32 %v398_v62, %v440_v63  ;;  %vm525_vm7 = vcmp.ge.f32.partialorder %v517_v1, 3.0  ;;  %vm639_vm9 = vcmp.le.f32.partialorder %v1502_v28, %v632_v61 }
 0x117   : > { %vm638_vm8 = vcmp.le.f32.partialorder %v1504_v29, %v636_v9  ;;  %v485_v13 = vrot.slane %v481_v3, 3  ;;  %v486_v14 = vrot.slane %v482_v6, 3  ;;  %v606_v15 = vrot.slane %v605_v11, 2 }
 0x118   : > { %vm640_vm10 = vcmp.le.f32.partialorder %v1510_v32, %v636_v9  ;;  %vm526_vm11 = vcmp.ge.f32.partialorder %v524_v7, 3.0  ;;  %v562_v16 = vrot.slane %v561_v8, 1  ;;  %v1195_v17 = vsel %vm637_vm6, 1.0, %v1390_v0 }
 0x119   : > { %v1196_v19 = vsel %vm638_vm8, 1.0, %v1390_v0  ;;  %v527_v23 = vsel %vm525_vm7, %v1500_v25, inf  ;;  %v569_v26 = vrot.slane %v568_v10, 1  ;;  %v613_v27 = vrot.slane %v612_v12, 2 }
 0x11a   : > { %v1197_v30 = vsel %vm639_vm9, 1.0, %v1390_v0  ;;  %v489_v31 = vmin.f32 %v443_v2, %v485_v13  ;;  %v490_v33 = vmin.f32 %v444_v56, %v486_v14  ;;  %v1198_v35 = vsel %vm640_vm10, 1.0, %v1390_v0 }
 0x11b   : > { %v649_v36 = vadd.f32 %v1197_v30, %v1195_v17  ;;  %v528_v37 = vsel %vm526_vm11, %v1504_v29, inf  ;;  %v607_v38 = vadd.f32 %v606_v15, %v605_v11  ;;  %v656_v39 = vadd.f32 %v1198_v35, %v1196_v19 }
 0x11c   : > { %v678_v40 = vrot.slane %v1502_v28, %v1492_v20  ;;  %v531_v41 = vrot.slane %v527_v23, 4  ;;  %v563_v42 = vadd.f32 %v562_v16, %v561_v8  ;;  %v682_v46 = vrot.slane %v1510_v32, %v1492_v20 }
 0x11d   : > { %v650_v45 = vrot.slane %v649_v36, 4  ;;  %v570_v47 = vadd.f32 %v569_v26, %v568_v10  ;;  %v614_v49 = vadd.f32 %v613_v27, %v612_v12  ;;  %v657_v50 = vrot.slane %v656_v39, 4 }
 0x11e   : > { %vm683_vm12 = vcmp.le.f32.partialorder %v1500_v25, %v678_v40  ;;  %v532_v51 = vrot.slane %v528_v37, 4  ;;  %vm684_vm13 = vcmp.le.f32.partialorder %v1504_v29, %v682_v46  ;;  %vm685_vm14 = vcmp.le.f32.partialorder %v1502_v28, %v678_v40 }
 0x11f   : > { %v651_v52 = vadd.f32 %v650_v45, %v649_v36  ;;  %v608_v53 = vrot.slane %v607_v38, 1  ;;  %v658_v18 = vadd.f32 %v657_v50, %v656_v39  ;;  %vm686_vm15 = vcmp.le.f32.partialorder %v1510_v32, %v682_v46 }
 0x120   : > { %v1199_v54 = vsel %vm683_vm12, 1.0, %v1390_v0  ;;  %vm571_vm0 = vcmp.ge.f32.partialorder %v563_v42, 3.0  ;;  %v1200_v57 = vsel %vm684_vm13, 1.0, %v1390_v0  ;;  %v718_v58 = vrot.slane %v1502_v28, %v1495_v21 }
 0x121   : > { %v652_v55 = vrot.slane %v651_v52, 2  ;;  %vm572_vm1 = vcmp.ge.f32.partialorder %v570_v47, 3.0  ;;  %v615_v59 = vrot.slane %v614_v49, 1  ;;  %v659_v60 = vrot.slane %v658_v18, 2 }
 0x122   : > { %v1201_v61 = vsel %vm685_vm14, 1.0, %v1390_v0  ;;  %v1202_v63 = vsel %vm686_vm15, 1.0, %v1390_v0  ;;  %v722_v2 = vrot.slane %v1510_v32, %v1495_v21  ;;  %v535_v3 = vmin.f32 %v489_v31, %v531_v41 }
 0x123   : > { %v653_v62 = vadd.f32 %v652_v55, %v651_v52  ;;  %v695_v1 = vadd.f32 %v1201_v61, %v1199_v54  ;;  %v573_v4 = vsel %vm571_vm0, %v1500_v25, inf  ;;  %v609_v5 = vadd.f32 %v608_v53, %v607_v38 }
 0x124   : > { %v702_v6 = vadd.f32 %v1202_v63, %v1200_v57  ;;  %v660_v7 = vadd.f32 %v659_v60, %v658_v18  ;;  %vm723_vm2 = vcmp.le.f32.partialorder %v1500_v25, %v718_v58  ;;  %vm724_vm3 = vcmp.le.f32.partialorder %v1504_v29, %v722_v2 }
 0x125   : > { %v696_v8 = vrot.slane %v695_v1, 4  ;;  %v574_v9 = vsel %vm572_vm1, %v1504_v29, inf  ;;  %vm725_vm4 = vcmp.le.f32.partialorder %v1502_v28, %v718_v58  ;;  %vm726_vm5 = vcmp.le.f32.partialorder %v1510_v32, %v722_v2 }
 0x126   : > { %v703_v10 = vrot.slane %v702_v6, 4  ;;  %v616_v21 = vadd.f32 %v615_v59, %v614_v49  ;;  %v654_v11 = vrot.slane %v653_v62, 1  ;;  %v1203_v12 = vsel %vm723_vm2, 1.0, %v1390_v0 }
 0x127   : > { %v1204_v56 = vsel %vm724_vm3, 1.0, %v1390_v0  ;;  %vm617_vm6 = vcmp.ge.f32.partialorder %v609_v5, 3.0  ;;  %v697_v13 = vadd.f32 %v696_v8, %v695_v1  ;;  %v1205_v14 = vsel %vm725_vm4, 1.0, %v1390_v0 }
 0x128   : > { %v1206_v15 = vsel %vm726_vm5, 1.0, %v1390_v0  ;;  %v661_v16 = vrot.slane %v660_v7, 1  ;;  %v704_v17 = vadd.f32 %v703_v10, %v702_v6  ;;  %v735_v19 = vadd.f32 %v1205_v14, %v1203_v12 }
 0x129   : > { %v742_v23 = vadd.f32 %v1206_v15, %v1204_v56  ;;  %v536_v26 = vmin.f32 %v490_v33, %v532_v51  ;;  %v577_v27 = vrot.slane %v573_v4, 5  ;;  %v578_v30 = vrot.slane %v574_v9, 5 }
 0x12a   : > { %v764_v31 = vrot.slane %v1502_v28, %v1498_v24  ;;  %vm618_vm7 = vcmp.ge.f32.partialorder %v616_v21, 3.0  ;;  %v619_v35 = vsel %vm617_vm6, %v1500_v25, inf  ;;  %v655_v36 = vadd.f32 %v654_v11, %v653_v62 }
 0x12b   : > { %v736_v37 = vrot.slane %v735_v19, 4  ;;  %v581_v38 = vmin.f32 %v535_v3, %v577_v27  ;;  %v698_v39 = vrot.slane %v697_v13, 2  ;;  %v743_v40 = vrot.slane %v742_v23, 4 }
 0x12c   : > { %v768_v41 = vrot.slane %v1510_v32, %v1498_v24  ;;  %v662_v42 = vadd.f32 %v661_v16, %v660_v7  ;;  %v705_v45 = vrot.slane %v704_v17, 2  ;;  %vm769_vm8 = vcmp.le.f32.partialorder %v1500_v25, %v764_v31 }
 0x12d   : > { %v737_v46 = vadd.f32 %v736_v37, %v735_v19  ;;  %v620_v33 = vsel %vm618_vm7, %v1504_v29, inf  ;;  %v623_v47 = vrot.slane %v619_v35, 6  ;;  %v744_v49 = vadd.f32 %v743_v40, %v742_v23 }
 0x12e   : > { %vm770_vm9 = vcmp.le.f32.partialorder %v1504_v29, %v768_v41  ;;  %vm663_vm10 = vcmp.ge.f32.partialorder %v655_v36, 3.0  ;;  %vm771_vm11 = vcmp.le.f32.partialorder %v1502_v28, %v764_v31  ;;  %vm772_vm12 = vcmp.le.f32.partialorder %v1510_v32, %v768_v41 }
 0x12f   : > { %v738_v50 = vrot.slane %v737_v46, 2  ;;  %v699_v51 = vadd.f32 %v698_v39, %v697_v13  ;;  %v745_v52 = vrot.slane %v744_v49, 2  ;;  %v1207_v24 = vsel %vm769_vm8, 1.0, %v1390_v0 }
 0x130   : > { %v1208_v53 = vsel %vm770_vm9, 1.0, %v1390_v0  ;;  %vm664_vm13 = vcmp.ge.f32.partialorder %v662_v42, 3.0  ;;  %v706_v18 = vadd.f32 %v705_v45, %v704_v17  ;;  %v1209_v54 = vsel %vm771_vm11, 1.0, %v1390_v0 }
 0x131   : > { %v1210_v55 = vsel %vm772_vm12, 1.0, %v1390_v0  ;;  %v665_v57 = vsel %vm663_vm10, %v1500_v25, inf  ;;  %v739_v58 = vadd.f32 %v738_v50, %v737_v46  ;;  %v746_v59 = vadd.f32 %v745_v52, %v744_v49 }
 0x132   : > { %v781_v60 = vadd.f32 %v1209_v54, %v1207_v24  ;;  %v582_v61 = vmin.f32 %v536_v26, %v578_v30  ;;  %v624_v62 = vrot.slane %v620_v33, 6  ;;  %v627_v63 = vmin.f32 %v581_v38, %v623_v47 }
 0x133   : > { %v788_v1 = vadd.f32 %v1210_v55, %v1208_v53  ;;  %v666_v2 = vsel %vm664_vm13, %v1504_v29, inf  ;;  %v700_v3 = vrot.slane %v699_v51, 1  ;;  %v810_v5 = vrot.slane %v1502_v28, %v1515_v34 }
 0x134   : > { %v782_v4 = vrot.slane %v781_v60, 4  ;;  %v669_v6 = vrot.slane %v665_v57, 7  ;;  %v707_v7 = vrot.slane %v706_v18, 1  ;;  %v814_v9 = vrot.slane %v1510_v32, %v1515_v34 }
 0x135   : > { %v789_v8 = vrot.slane %v788_v1, 4  ;;  %v740_v10 = vrot.slane %v739_v58, 1  ;;  %v747_v21 = vrot.slane %v746_v59, 1  ;;  %vm815_vm14 = vcmp.le.f32.partialorder %v1500_v25, %v810_v5 }
 0x136   : > { %v783_v11 = vadd.f32 %v782_v4, %v781_v60  ;;  %vm816_vm15 = vcmp.le.f32.partialorder %v1504_v29, %v814_v9  ;;  %vm817_vm0 = vcmp.le.f32.partialorder %v1502_v28, %v810_v5  ;;  %vm818_vm1 = vcmp.le.f32.partialorder %v1510_v32, %v814_v9 }
 0x137   : > { %v790_v12 = vadd.f32 %v789_v8, %v788_v1  ;;  %v628_v56 = vmin.f32 %v582_v61, %v624_v62  ;;  %v701_v13 = vadd.f32 %v700_v3, %v699_v51  ;;  %v1211_v14 = vsel %vm815_vm14, 1.0, %v1390_v0 }
 0x138   : > { %v856_v15 = vrot.slane %v1502_v28, %v1557_v22  ;;  %v670_v34 = vrot.slane %v666_v2, 7  ;;  %v1689_v16 = vmin.f32 %v627_v63, %v669_v6  ;;  %v708_v17 = vadd.f32 %v707_v7, %v706_v18 }
 0x139   : > { %v1212_v19 = vsel %vm816_vm15, 1.0, %v1390_v0  ;;  %v741_v23 = vadd.f32 %v740_v10, %v739_v58  ;;  %v748_v26 = vadd.f32 %v747_v21, %v746_v59  ;;  %v1213_v27 = vsel %vm817_vm0, 1.0, %v1390_v0 }
 0x13a   : > { %v1214_v30 = vsel %vm818_vm1, 1.0, %v1390_v0  ;;  %v784_v31 = vrot.slane %v783_v11, 2  ;;  %v791_v35 = vrot.slane %v790_v12, 2  ;;  %v827_v36 = vadd.f32 %v1213_v27, %v1211_v14 }
 0x13b   : > { %v834_v37 = vadd.f32 %v1214_v30, %v1212_v19  ;;  %v674_v38 = vmin.f32 %v628_v56, %v670_v34  ;;  %vm709_vm2 = vcmp.ge.f32.partialorder %v701_v13, 3.0  ;;  %v860_v39 = vrot.slane %v1510_v32, %v1557_v22 }
 0x13c   : > { %vm861_vm3 = vcmp.le.f32.partialorder %v1500_v25, %v856_v15  ;;  %vm710_vm4 = vcmp.ge.f32.partialorder %v708_v17, 3.0  ;;  %v828_v40 = vrot.slane %v827_v36, 4  ;;  %vm863_vm5 = vcmp.le.f32.partialorder %v1502_v28, %v856_v15 }
 0x13d   : > { %v835_v41 = vrot.slane %v834_v37, 4  ;;  %vm749_vm6 = vcmp.ge.f32.partialorder %v741_v23, 3.0  ;;  %vm750_vm7 = vcmp.ge.f32.partialorder %v748_v26, 3.0  ;;  %vm862_vm8 = vcmp.le.f32.partialorder %v1504_v29, %v860_v39 }
 0x13e   : > { %vm864_vm9 = vcmp.le.f32.partialorder %v1510_v32, %v860_v39  ;;  %v785_v42 = vadd.f32 %v784_v31, %v783_v11  ;;  %v792_v45 = vadd.f32 %v791_v35, %v790_v12  ;;  %v1215_v46 = vsel %vm861_vm3, 1.0, %v1390_v0 }
 0x13f   : > { %v1216_v33 = vsel %vm862_vm8, 1.0, %v1390_v0  ;;  %v711_v22 = vsel %vm709_vm2, %v1502_v28, inf  ;;  %v1217_v47 = vsel %vm863_vm5, 1.0, %v1390_v0  ;;  %v1218_v49 = vsel %vm864_vm9, 1.0, %v1390_v0 }
 0x140   : > { %v902_v50 = vrot.slane %v1502_v28, %v1565_v43  ;;  %v712_v51 = vsel %vm710_vm4, %v1510_v32, inf  ;;  %v751_v52 = vsel %vm749_vm6, %v1502_v28, inf  ;;  %v829_v24 = vadd.f32 %v828_v40, %v827_v36 }
 0x141   : > { %v836_v53 = vadd.f32 %v835_v41, %v834_v37  ;;  %v713_v18 = vmin.f32 %v1689_v16, %v711_v22  ;;  %v752_v54 = vsel %vm750_vm7, %v1510_v32, inf  ;;  %v873_v55 = vadd.f32 %v1217_v47, %v1215_v46 }
 0x142   : > { %v880_v57 = vadd.f32 %v1218_v49, %v1216_v33  ;;  %v714_v58 = vmin.f32 %v674_v38, %v712_v51  ;;  %v786_v59 = vrot.slane %v785_v42, 1  ;;  %v793_v60 = vrot.slane %v792_v45, 1 }
 0x143   : > { %v906_v61 = vrot.slane %v1510_v32, %v1565_v43  ;;  %v755_v62 = vrot.slane %v751_v52, 1  ;;  %v874_v63 = vrot.slane %v873_v55, 4  ;;  %vm907_vm10 = vcmp.le.f32.partialorder %v1500_v25, %v902_v50 }
 0x144   : > { %v881_v1 = vrot.slane %v880_v57, 4  ;;  %v756_v2 = vrot.slane %v752_v54, 1  ;;  %v830_v3 = vrot.slane %v829_v24, 2  ;;  %v837_v4 = vrot.slane %v836_v53, 2 }
 0x145   : > { %vm908_vm11 = vcmp.le.f32.partialorder %v1504_v29, %v906_v61  ;;  %v875_v5 = vadd.f32 %v874_v63, %v873_v55  ;;  %vm909_vm12 = vcmp.le.f32.partialorder %v1502_v28, %v902_v50  ;;  %vm910_vm13 = vcmp.le.f32.partialorder %v1510_v32, %v906_v61 }
 0x146   : > { %v882_v6 = vadd.f32 %v881_v1, %v880_v57  ;;  %v787_v7 = vadd.f32 %v786_v59, %v785_v42  ;;  %v794_v8 = vadd.f32 %v793_v60, %v792_v45  ;;  %v1219_v43 = vsel %vm907_vm10, 1.0, %v1390_v0 }
 0x147   : > { %v1220_v9 = vsel %vm908_vm11, 1.0, %v1390_v0  ;;  %v876_v10 = vrot.slane %v875_v5, 2  ;;  %v1221_v11 = vsel %vm909_vm12, 1.0, %v1390_v0  ;;  %v1222_v12 = vsel %vm910_vm13, 1.0, %v1390_v0 }
 0x148   : > { %v883_v21 = vrot.slane %v882_v6, 2  ;;  %v831_v56 = vadd.f32 %v830_v3, %v829_v24  ;;  %v838_v13 = vadd.f32 %v837_v4, %v836_v53  ;;  %v919_v14 = vadd.f32 %v1221_v11, %v1219_v43 }
 0x149   : > { %v926_v15 = vadd.f32 %v1222_v12, %v1220_v9  ;;  %v759_v34 = vmin.f32 %v713_v18, %v755_v62  ;;  %v760_v16 = vmin.f32 %v714_v58, %v756_v2  ;;  %vm795_vm14 = vcmp.ge.f32.partialorder %v787_v7, 3.0 }
 0x14a   : > { %vm796_vm15 = vcmp.ge.f32.partialorder %v794_v8, 3.0  ;;  %v920_v17 = vrot.slane %v919_v14, 4  ;;  %v877_v23 = vadd.f32 %v876_v10, %v875_v5  ;;  %v884_v26 = vadd.f32 %v883_v21, %v882_v6 }
 0x14b   : > { %v927_v19 = vrot.slane %v926_v15, 4  ;;  %v948_v27 = vrot.slane %v1502_v28, %v1568_v44  ;;  %v952_v30 = vrot.slane %v1510_v32, %v1568_v44  ;;  %v832_v31 = vrot.slane %v831_v56, 1 }
 0x14c   : > { %v839_v35 = vrot.slane %v838_v13, 1  ;;  %v921_v36 = vadd.f32 %v920_v17, %v919_v14  ;;  %v797_v38 = vsel %vm795_vm14, %v1502_v28, inf  ;;  %v798_v39 = vsel %vm796_vm15, %v1510_v32, inf }
 0x14d   : > { %v928_v37 = vadd.f32 %v927_v19, %v926_v15  ;;  %vm953_vm0 = vcmp.le.f32.partialorder %v1500_v25, %v948_v27  ;;  %vm954_vm1 = vcmp.le.f32.partialorder %v1504_v29, %v952_v30  ;;  %vm955_vm2 = vcmp.le.f32.partialorder %v1502_v28, %v948_v27 }
 0x14e   : > { %v922_v40 = vrot.slane %v921_v36, 2  ;;  %vm956_vm3 = vcmp.le.f32.partialorder %v1510_v32, %v952_v30  ;;  %v878_v42 = vrot.slane %v877_v23, 1  ;;  %v885_v44 = vrot.slane %v884_v26, 1 }
 0x14f   : > { %v929_v41 = vrot.slane %v928_v37, 2  ;;  %v1223_v45 = vsel %vm953_vm0, 1.0, %v1390_v0  ;;  %v1224_v46 = vsel %vm954_vm1, 1.0, %v1390_v0  ;;  %v801_v33 = vrot.slane %v797_v38, 2 }
 0x150   : > { %v802_v22 = vrot.slane %v798_v39, 2  ;;  %v833_v47 = vadd.f32 %v832_v31, %v831_v56  ;;  %v840_v49 = vadd.f32 %v839_v35, %v838_v13  ;;  %v923_v50 = vadd.f32 %v922_v40, %v921_v36 }
 0x151   : > { %v930_v51 = vadd.f32 %v929_v41, %v928_v37  ;;  %v1225_v52 = vsel %vm955_vm2, 1.0, %v1390_v0  ;;  %v1226_v24 = vsel %vm956_vm3, 1.0, %v1390_v0  ;;  %v805_v53 = vmin.f32 %v759_v34, %v801_v33 }
 0x152   : > { %v806_v18 = vmin.f32 %v760_v16, %v802_v22  ;;  %v965_v54 = vadd.f32 %v1225_v52, %v1223_v45  ;;  %v972_v55 = vadd.f32 %v1226_v24, %v1224_v46  ;;  %v879_v57 = vadd.f32 %v878_v42, %v877_v23 }
 0x153   : > { %v886_v58 = vadd.f32 %v885_v44, %v884_v26  ;;  %v994_v59 = vrot.slane %v1502_v28, %v1573_v48  ;;  %v998_v60 = vrot.slane %v1510_v32, %v1573_v48  ;;  %vm841_vm4 = vcmp.ge.f32.partialorder %v833_v47, 3.0 }
 0x154   : > { %vm842_vm5 = vcmp.ge.f32.partialorder %v840_v49, 3.0  ;;  %v966_v61 = vrot.slane %v965_v54, 4  ;;  %v973_v62 = vrot.slane %v972_v55, 4  ;;  %v924_v63 = vrot.slane %v923_v50, 1 }
 0x155   : > { %v931_v1 = vrot.slane %v930_v51, 1  ;;  %vm999_vm6 = vcmp.le.f32.partialorder %v1500_v25, %v994_v59  ;;  %vm1000_vm7 = vcmp.le.f32.partialorder %v1504_v29, %v998_v60  ;;  %vm1001_vm8 = vcmp.le.f32.partialorder %v1502_v28, %v994_v59 }
 0x156   : > { %v967_v2 = vadd.f32 %v966_v61, %v965_v54  ;;  %v974_v3 = vadd.f32 %v973_v62, %v972_v55  ;;  %vm1002_vm9 = vcmp.le.f32.partialorder %v1510_v32, %v998_v60  ;;  %v843_v4 = vsel %vm841_vm4, %v1502_v28, inf }
 0x157   : > { %v844_v48 = vsel %vm842_vm5, %v1510_v32, inf  ;;  %vm887_vm10 = vcmp.ge.f32.partialorder %v879_v57, 3.0  ;;  %vm888_vm11 = vcmp.ge.f32.partialorder %v886_v58, 3.0  ;;  %v1227_v7 = vsel %vm999_vm6, 1.0, %v1390_v0 }
 0x158   : > { %v968_v5 = vrot.slane %v967_v2, 2  ;;  %v975_v6 = vrot.slane %v974_v3, 2  ;;  %v1228_v8 = vsel %vm1000_vm7, 1.0, %v1390_v0  ;;  %v925_v43 = vadd.f32 %v924_v63, %v923_v50 }
 0x159   : > { %v932_v9 = vadd.f32 %v931_v1, %v930_v51  ;;  %v1229_v10 = vsel %vm1001_vm8, 1.0, %v1390_v0  ;;  %v1230_v21 = vsel %vm1002_vm9, 1.0, %v1390_v0  ;;  %v847_v11 = vrot.slane %v843_v4, 3 }
 0x15a   : > { %v848_v12 = vrot.slane %v844_v48, 3  ;;  %v969_v56 = vadd.f32 %v968_v5, %v967_v2  ;;  %v976_v13 = vadd.f32 %v975_v6, %v974_v3  ;;  %v889_v14 = vsel %vm887_vm10, %v1502_v28, inf }
 0x15b   : > { %v890_v15 = vsel %vm888_vm11, %v1510_v32, inf  ;;  %v1011_v34 = vadd.f32 %v1229_v10, %v1227_v7  ;;  %v1018_v16 = vadd.f32 %v1230_v21, %v1228_v8  ;;  %v851_v17 = vmin.f32 %v805_v53, %v847_v11 }
 0x15c   : > { %v852_v19 = vmin.f32 %v806_v18, %v848_v12  ;;  %v970_v23 = vrot.slane %v969_v56, 1  ;;  %v977_v26 = vrot.slane %v976_v13, 1  ;;  %vm933_vm12 = vcmp.ge.f32.partialorder %v925_v43, 3.0 }
 0x15d   : > { %vm934_vm13 = vcmp.ge.f32.partialorder %v932_v9, 3.0  ;;  %v1012_v27 = vrot.slane %v1011_v34, 4  ;;  %v1019_v30 = vrot.slane %v1018_v16, 4  ;;  %v893_v31 = vrot.slane %v889_v14, 4 }
 0x15e   : > { %v894_v35 = vrot.slane %v890_v15, 4  ;;  %v971_v36 = vadd.f32 %v970_v23, %v969_v56  ;;  %v978_v37 = vadd.f32 %v977_v26, %v976_v13  ;;  %v935_v42 = vsel %vm933_vm12, %v1502_v28, inf }
 0x15f   : > { %v1013_v38 = vadd.f32 %v1012_v27, %v1011_v34  ;;  %v1020_v39 = vadd.f32 %v1019_v30, %v1018_v16  ;;  %v897_v40 = vmin.f32 %v851_v17, %v893_v31  ;;  %v936_v44 = vsel %vm934_vm13, %v1510_v32, inf }
 0x160   : > { %v898_v41 = vmin.f32 %v852_v19, %v894_v35  ;;  %vm979_vm14 = vcmp.ge.f32.partialorder %v971_v36, 3.0  ;;  %vm980_vm15 = vcmp.ge.f32.partialorder %v978_v37, 3.0  ;;  %v939_v33 = vrot.slane %v935_v42, 5 }
 0x161   : > { %v1014_v45 = vrot.slane %v1013_v38, 2  ;;  %v1021_v46 = vrot.slane %v1020_v39, 2  ;;  %v940_v22 = vrot.slane %v936_v44, 5  ;;  %v981_v50 = vsel %vm979_vm14, %v1502_v28, inf }
 0x162   : > { %v982_v51 = vsel %vm980_vm15, %v1510_v32, inf  ;;  %v943_v52 = vmin.f32 %v897_v40, %v939_v33  ;;  %v985_v54 = vrot.slane %v981_v50, 6 }
 0x163   : > { %v1015_v47 = vadd.f32 %v1014_v45, %v1013_v38  ;;  %v1022_v49 = vadd.f32 %v1021_v46, %v1020_v39  ;;  %v944_v24 = vmin.f32 %v898_v41, %v940_v22  ;;  %v986_v55 = vrot.slane %v982_v51, 6 }
 0x164   : > { %v989_v59 = vmin.f32 %v943_v52, %v985_v54 }
 0x165   : > { %v1016_v53 = vrot.slane %v1015_v47, 1  ;;  %v1023_v18 = vrot.slane %v1022_v49, 1  ;;  %v990_v60 = vmin.f32 %v944_v24, %v986_v55 }
 0x167   : > { %v1017_v57 = vadd.f32 %v1016_v53, %v1015_v47  ;;  %v1024_v58 = vadd.f32 %v1023_v18, %v1022_v49 }
 0x169   : > { %vm1025_vm0 = vcmp.ge.f32.partialorder %v1017_v57, 3.0  ;;  %vm1026_vm1 = vcmp.ge.f32.partialorder %v1024_v58, 3.0 }
 0x16a   : > { %v1027_v61 = vsel %vm1025_vm0, %v1502_v28, inf  ;;  %v1028_v62 = vsel %vm1026_vm1, %v1510_v32, inf }
 0x16b   : > { %v1031_v63 = vrot.slane %v1027_v61, 7  ;;  %v1032_v1 = vrot.slane %v1028_v62, 7 }
 0x16d   : > { %v1035_v2 = vmin.f32 %v989_v59, %v1031_v63  ;;  %v1036_v3 = vmin.f32 %v990_v60, %v1032_v1 }
 0x16f   : > { %v1040_v4 = vrot.slane %v1035_v2, %v1492_v20  ;;  %v1044_v48 = vrot.slane %v1036_v3, %v1492_v20 }
 0x171   : > { %vm1045_vm2 = vcmp.le.f32.partialorder %v1500_v25, %v1040_v4  ;;  %vm1046_vm3 = vcmp.le.f32.partialorder %v1504_v29, %v1044_v48  ;;  %vm1047_vm4 = vcmp.le.f32.partialorder %v1502_v28, %v1040_v4  ;;  %vm1048_vm5 = vcmp.le.f32.partialorder %v1510_v32, %v1044_v48 }
 0x172   : > { %v1231_v20 = vsel %vm1045_vm2, 1.0, %v1390_v0  ;;  %v1232_v5 = vsel %vm1046_vm3, 1.0, %v1390_v0  ;;  %v1233_v6 = vsel %vm1047_vm4, 1.0, %v1390_v0  ;;  %v1234_v7 = vsel %vm1048_vm5, 1.0, %v1390_v0 }
 0x173   : > { %1057 = vst [vmem:[%s188_s23] sm:$0xff] %v1231_v20  ;;  %1058 = vst [vmem:[%s188_s23 + $0x8] sm:$0xff] %v1232_v5 }
 0x174   : > { %1059 = vst [vmem:[%s188_s23 + $0x10] sm:$0xff] %v1233_v6  ;;  %1060 = vst [vmem:[%s188_s23 + $0x18] sm:$0xff] %v1234_v7 }
 0x175   : > { %1325 = shalt.err (!%p1322_p5)
}
 0x176   : > { %s1326_s7 = scalar_lea.hbm %s1768_s29, 512  ;;  %s1330_s10 = scalar_lea.hbm %s1830_s3, 1024 }
 0x177   : > { %p1327_p6 = scmp.ne.s32.totalorder %s1768_s29, %s1326_s7  ;;  %p1331_p10 = scmp.lt.s32.totalorder %s1768_s29, %s1830_s3 }
 0x178   : > { %p1332_p11 = scmp.lt.s32.totalorder %s1330_s10, %s1326_s7 }
 0x179   : > { %p1328_p7 = pnand %p1327_p6, %p1455_p4 }
 0x17a   : > { %p1333_p12 = por %p1332_p11, %p1331_p10 }
 0x17b   : > { %p1329_p9 = pneg %p1328_p7 }
 0x17d   : > { %p1334_p13 = pnand %p1333_p12, %p1329_p9 }
 0x17f   : > { %1337 = shalt.err (!%p1334_p13)
}
 0x180   : > { %s1393_s19 = smov 256   ;;  %s1394_s21 = smov 16  }
 0x181   : > { %1252 = dma.vmem_to_hbm [thread:$0]  (%p1455_p4), %s1770_s26, 512, %s1768_s29, %s1782_s15, %s1393_s19, %s1393_s19, %s1394_s21  }
 0x182 PF: > { %p1258_p0 = scmp.ge.s32.totalorder %s1388_s17, 2  ;;  %s1092_s23 = sand.u32 1, %s1368_s12  }
 0x183   : > { %s1093_s27 = scalar_lea.sflag [#allocation3], %s1092_s23 }
 0x184   : > { %p1255_p1 = pnand %p1258_p0, %p1462_p8 }
 0x186   : > { %p1256_p2 = pneg %p1255_p1 }
 0x188   : > { %1363 = dma.done.wait (%p1256_p2), %s1093_s27, 512  }
 0x189   : > { %1365 = vsyncadd (%p1256_p2), %s1093_s27, 4294966784  ;;  %s16_s17 = sadd.s32 1, %s1388_s17   ;;  %s1833_s12 = smov %s1372_s13 }
 0x18a   : > { %p13_p3 = scmp.ge.s32.totalorder %s16_s17, 4   ;;  %s1834_s13 = smov %s1376_s14 }
 0x18b   : > { %s1835_s14 = smov %s1468_s25  ;;  %s1836_s15 = smov %s1384_s16 }
 0x18c   : > { %s1837_s16 = smov %s1839_s20  ;;  %15 = sbr.rel (!%p13_p3) target bundleno = 4 (0x4), region = 67 }
 0x191   :  { %1098 = vsyncpa [#allocation3], 1 }
 0x192   :  { %1100 = vsyncpa [#allocation3 + $0x1], 1 }

</bundles_post_ra>
